<compile_context>
chip_gen: v6e
topology: v6e:2x2x1
jax: 0.10.0
libtpu: 0.0.40
codegen_flags: <defaults>
</compile_context>

<pallas_src>
import functools

import jax
import jax.numpy as jnp
from jax.experimental import pallas as pl
from jax.experimental.pallas import tpu as pltpu


def _round_up(x, m):
    return ((x + m - 1) // m) * m


# ---------------------------------------------------------------------------
# Kernel bodies
# ---------------------------------------------------------------------------

def _ffn_kernel_resident(x_ref, w1_ref, b1_ref, w2_ref, b2_ref, o_ref):
    """Fast path: full W1/W2 are VMEM-resident, single reduction step."""
    h = jnp.dot(x_ref[...], w1_ref[...], preferred_element_type=jnp.float32)
    h = jnp.maximum(h + b1_ref[...], 0.0)                  # b1 stays f32
    # TODO(synk): dropout omitted (eval-mode identity); a training path would
    # need pltpu.prng_seed + pltpu.prng_random_bits masking here.
    acc = jnp.dot(h.astype(w2_ref.dtype), w2_ref[...],
                  preferred_element_type=jnp.float32)
    o_ref[...] = (acc + b2_ref[...]).astype(o_ref.dtype)   # b2 stays f32


def _ffn_kernel_chunked(x_ref, w1_ref, b1_ref, w2_ref, b2_ref, o_ref, acc_ref):
    """Fallback: d_ffn chunked along trailing reduction axis, f32 accumulator."""
    k = pl.program_id(1)

    @pl.when(k == 0)
    def _init():
        # Fold b2 into the accumulator init (off the hot path).
        acc_ref[...] = jnp.broadcast_to(b2_ref[...], acc_ref.shape)

    h = jnp.dot(x_ref[...], w1_ref[...], preferred_element_type=jnp.float32)
    h = jnp.maximum(h + b1_ref[...], 0.0)
    acc_ref[...] += jnp.dot(h.astype(w2_ref.dtype), w2_ref[...],
                            preferred_element_type=jnp.float32)

    @pl.when(k == pl.num_programs(1) - 1)
    def _finalize():
        o_ref[...] = acc_ref[...].astype(o_ref.dtype)


# ---------------------------------------------------------------------------
# Tiling / VMEM planning
# ---------------------------------------------------------------------------

def _vmem_budget_bytes(vmem_limit_bytes):
    if vmem_limit_bytes is not None:
        return int(vmem_limit_bytes)
    try:
        cap = getattr(pltpu.get_tpu_info(), "vmem_capacity_bytes", None)
    except Exception:  # pragma: no cover - interpret mode / old jax
        cap = None
    if cap is None:
        cap = 64 * 1024 * 1024  # conservative (v7x-sized) fallback
    # Leave headroom for compiler scratch; ~100 MiB cap on big-VMEM chips.
    return min(int(cap * 0.8), 100 * 1024 * 1024)


def _plan_tiles(rows, d_model, d_ffn, c_itemsize, o_itemsize,
                row_tile, max_ffn_tile, vmem_limit):
    """Pick (row_tile tm, d_ffn chunk tk). tk == d_ffn means resident weights."""
    granule = 16 if c_itemsize < 4 else 8         # bf16 sublane packing
    tm = min(_round_up(row_tile, granule), _round_up(rows, granule))
    budget = int(vmem_limit * 0.6)                # headroom for double-buffering slack

    def est(tm_, tk_, chunked):
        b = 2 * tm_ * d_model * (c_itemsize + o_itemsize)   # x + out (dbl buffered)
        b += 2 * 2 * d_model * tk_ * c_itemsize              # W1 + W2 (dbl buffered)
        b += 2 * (tk_ + d_model) * 4                          # biases (f32)
        if chunked:
            b += tm_ * d_model * 4                            # f32 accumulator
        return b

    cap = d_ffn if max_ffn_tile is None else min(d_ffn, int(max_ffn_tile))
    if cap >= d_ffn and est(tm, d_ffn, False) <= budget:
        return tm, d_ffn                                      # resident weights
    if d_ffn <= 128:
        return tm, d_ffn                                      # too small to chunk
    tk = max(128, (min(cap, d_ffn) // 128) * 128)
    while tk > 128 and est(tm, tk, True) > budget:
        tk -= 128
    while tm > granule and est(tm, tk, True) > budget:
        tm -= granule
    return tm, tk


# ---------------------------------------------------------------------------
# Public wrapper
# ---------------------------------------------------------------------------

@functools.partial(jax.jit, static_argnames=("compute_dtype", "row_tile",
                                              "max_ffn_tile", "vmem_limit_bytes"))
def position_wise_feed_forward(x, w1, b1, w2, b2, *, compute_dtype=jnp.bfloat16,
                               row_tile=512, max_ffn_tile=None,
                               vmem_limit_bytes=None):
    """y = ReLU(x @ W1 + b1) @ W2 + b2   (dropout = eval-mode identity).

    x:  (batch, seq, d_model)
    w1: (d_model, d_ffn)   b1: (d_ffn,)
    w2: (d_ffn, d_model)   b2: (d_model,)
    """
    batch, seq, d_model = x.shape
    d_ffn = w1.shape[1]
    rows = batch * seq
    out_dtype = x.dtype

    cdt = jnp.dtype(compute_dtype) if compute_dtype is not None else jnp.dtype(x.dtype)
    c_itemsize = cdt.itemsize
    o_itemsize = jnp.dtype(out_dtype).itemsize

    vmem_limit = _vmem_budget_bytes(vmem_limit_bytes)
    tm, tk = _plan_tiles(rows, d_model, d_ffn, c_itemsize, o_itemsize,
                         row_tile, max_ffn_tile, vmem_limit)

    rows_pad = _round_up(rows, tm)
    nk = 1 if tk == d_ffn else pl.cdiv(d_ffn, tk)
    d_ffn_pad = d_ffn if nk == 1 else nk * tk

    # Matmul operands in compute dtype (bf16 default); biases stay f32.
    x2d = x.reshape(rows, d_model).astype(cdt)
    w1c = w1.astype(cdt)
    w2c = w2.astype(cdt)
    b1f = b1.reshape(1, d_ffn).astype(jnp.float32)
    b2f = b2.reshape(1, d_model).astype(jnp.float32)

    if rows_pad != rows:
        x2d = jnp.pad(x2d, ((0, rows_pad - rows), (0, 0)))
    if d_ffn_pad != d_ffn:
        # Zero-padded W1 columns / b1 entries give h = ReLU(0) = 0, and the
        # matching zero W2 rows contribute nothing: padding is exact.
        w1c = jnp.pad(w1c, ((0, 0), (0, d_ffn_pad - d_ffn)))
        b1f = jnp.pad(b1f, ((0, 0), (0, d_ffn_pad - d_ffn)))
        w2c = jnp.pad(w2c, ((0, d_ffn_pad - d_ffn), (0, 0)))

    # Weights stream from HBM once when resident, once per row tile when chunked.
    weight_passes = 1 if nk == 1 else rows_pad // tm
    cost = pl.CostEstimate(
        flops=4 * rows_pad * d_model * d_ffn_pad,
        transcendentals=0,
        bytes_accessed=(rows_pad * d_model * (c_itemsize + o_itemsize)
                        + weight_passes * 2 * d_model * d_ffn_pad * c_itemsize
                        + (d_ffn_pad + d_model) * 4),
    )

    if nk == 1:
        grid = (rows_pad // tm,)
        in_specs = [
            pl.BlockSpec((tm, d_model), lambda i: (i, 0)),          # x rows
            pl.BlockSpec((d_model, d_ffn_pad), lambda i: (0, 0)),   # W1 (resident)
            pl.BlockSpec((1, d_ffn_pad), lambda i: (0, 0)),         # b1
            pl.BlockSpec((d_ffn_pad, d_model), lambda i: (0, 0)),   # W2 (resident)
            pl.BlockSpec((1, d_model), lambda i: (0, 0)),           # b2
        ]
        out_specs = pl.BlockSpec((tm, d_model), lambda i: (i, 0))
        scratch = []
        kernel = _ffn_kernel_resident
        semantics = ("parallel",)
    else:
        grid = (rows_pad // tm, nk)  # reduction axis last
        in_specs = [
            pl.BlockSpec((tm, d_model), lambda i, k: (i, 0)),       # x rows
            pl.BlockSpec((d_model, tk), lambda i, k: (0, k)),       # W1 chunk
            pl.BlockSpec((1, tk), lambda i, k: (0, k)),             # b1 chunk
            pl.BlockSpec((tk, d_model), lambda i, k: (k, 0)),       # W2 chunk
            pl.BlockSpec((1, d_model), lambda i, k: (0, 0)),        # b2
        ]
        out_specs = pl.BlockSpec((tm, d_model), lambda i, k: (i, 0))
        scratch = [pltpu.VMEM((tm, d_model), jnp.float32)]
        kernel = _ffn_kernel_chunked
        semantics = ("parallel", "arbitrary")

    out2d = pl.pallas_call(
        kernel,
        out_shape=jax.ShapeDtypeStruct((rows_pad, d_model), out_dtype),
        grid_spec=pltpu.PrefetchScalarGridSpec(
            num_scalar_prefetch=0,
            grid=grid,
            in_specs=in_specs,
            out_specs=out_specs,
            scratch_shapes=scratch,
        ),
        compiler_params=pltpu.CompilerParams(
            dimension_semantics=semantics,
            vmem_limit_bytes=vmem_limit,
        ),
        cost_estimate=cost,
    )(x2d, w1c, b1f, w2c, b2f)

    if rows_pad != rows:
        out2d = out2d[:rows]
    return out2d.reshape(batch, seq, d_model)


# ---------------------------------------------------------------------------
# Demo / correctness checks
# ---------------------------------------------------------------------------

def init_params(key, d_model, d_ffn, dtype=jnp.float32):
    """torch.nn.Linear-style init: U(-1/sqrt(fan_in), 1/sqrt(fan_in))."""
    k1, k2, k3, k4 = jax.random.split(key, 4)
    lim1 = 1.0 / (d_model ** 0.5)
    lim2 = 1.0 / (d_ffn ** 0.5)
    w1 = jax.random.uniform(k1, (d_model, d_ffn), dtype, -lim1, lim1)
    b1 = jax.random.uniform(k2, (d_ffn,), dtype, -lim1, lim1)
    w2 = jax.random.uniform(k3, (d_ffn, d_model), dtype, -lim2, lim2)
    b2 = jax.random.uniform(k4, (d_model,), dtype, -lim2, lim2)
    return w1, b1, w2, b2


def _reference(x, w1, b1, w2, b2):
    hp = jax.lax.Precision.HIGHEST
    h = jnp.maximum(jnp.dot(x, w1, precision=hp) + b1, 0.0)
    return jnp.dot(h, w2, precision=hp) + b2


if __name__ == "__main__":
    key = jax.random.PRNGKey(0)
    k_x, k_p, k_x2, k_p2 = jax.random.split(key, 4)

    # --- Test A: resident-weight fast path, exact f32 compute --------------
    batch, seq, d_model, d_ffn = 2, 8, 32, 64
    x = jax.random.normal(k_x, (batch, seq, d_model), dtype=jnp.float32)
    w1, b1, w2, b2 = init_params(k_p, d_model, d_ffn)
    ref = _reference(x, w1, b1, w2, b2)

    out_f32 = jax.block_until_ready(
        position_wise_feed_forward(x, w1, b1, w2, b2, compute_dtype=jnp.float32))
    assert out_f32.shape == (batch, seq, d_model)
    assert jnp.allclose(out_f32, ref, atol=1e-4, rtol=1e-4)

    # --- Test B: default bf16 compute (fast MXU mode), f32 accumulation ----
    out_bf16 = jax.block_until_ready(
        position_wise_feed_forward(x, w1, b1, w2, b2))
    assert out_bf16.shape == (batch, seq, d_model)
    assert jnp.allclose(out_bf16, ref, atol=6e-2, rtol=6e-2)

    # --- Test C: chunked-reduction path + row padding (odd row count) ------
    batch2, seq2, d_model2, d_ffn2 = 2, 5, 128, 256   # rows=10 -> padded to 16
    x2 = jax.random.normal(k_x2, (batch2, seq2, d_model2), dtype=jnp.float32)
    p2 = init_params(k_p2, d_model2, d_ffn2)
    out_c = jax.block_until_ready(
        position_wise_feed_forward(x2, *p2, compute_dtype=jnp.float32,
                                   max_ffn_tile=128))
    ref_c = _reference(x2, *p2)
    assert out_c.shape == (batch2, seq2, d_model2)
    assert jnp.allclose(out_c, ref_c, atol=1e-4, rtol=1e-4)

    print("KERNEL_OK")
</pallas_src>

<mosaic_0001>
module attributes {stable_mosaic.version = 11 : i64} {
  func.func @_ffn_kernel_resident(%arg0: i32, %arg1: memref<16x32xf32, #tpu.memory_space<vmem>>, %arg2: memref<32x64xf32, #tpu.memory_space<vmem>>, %arg3: memref<1x64xf32, #tpu.memory_space<vmem>>, %arg4: memref<64x32xf32, #tpu.memory_space<vmem>>, %arg5: memref<1x32xf32, #tpu.memory_space<vmem>>, %arg6: memref<16x32xf32, #tpu.memory_space<vmem>>) attributes {dimension_semantics = [#tpu.dimension_semantics<parallel>], iteration_bounds = array<i64: 1>, scalar_prefetch = 0 : i64, scratch_operands = 0 : i64, tpu.core_type = #tpu.core_type<tc>, window_params = [{transform_indices = @transform_0, window_bounds = array<i64: 16, 32>}, {pipeline_mode = #tpu.pipeline_mode<synchronous>, transform_indices = @transform_1, window_bounds = array<i64: 32, 64>}, {pipeline_mode = #tpu.pipeline_mode<synchronous>, transform_indices = @transform_2, window_bounds = array<i64: 1, 64>}, {pipeline_mode = #tpu.pipeline_mode<synchronous>, transform_indices = @transform_3, window_bounds = array<i64: 64, 32>}, {pipeline_mode = #tpu.pipeline_mode<synchronous>, transform_indices = @transform_4, window_bounds = array<i64: 1, 32>}, {transform_indices = @transform_5, window_bounds = array<i64: 16, 32>}]} {
    %c0 = arith.constant 0 : index
    %c0_0 = arith.constant 0 : index
    %0 = vector.load %arg1[%c0, %c0_0] : memref<16x32xf32, #tpu.memory_space<vmem>>, vector<16x32xf32>
    %c0_1 = arith.constant 0 : index
    %c0_2 = arith.constant 0 : index
    %1 = vector.load %arg2[%c0_1, %c0_2] : memref<32x64xf32, #tpu.memory_space<vmem>>, vector<32x64xf32>
    %cst = arith.constant dense<0.000000e+00> : vector<16x64xf32>
    %2 = tpu.matmul %0, %1, %cst {dimension_numbers = #tpu.dot_dimension_numbers<[1], [0], [0], [1], [0, 0, 1, 1], [], []>} : vector<16x32xf32>, vector<32x64xf32>, vector<16x64xf32> -> vector<16x64xf32>
    %c0_3 = arith.constant 0 : index
    %c0_4 = arith.constant 0 : index
    %3 = vector.load %arg3[%c0_3, %c0_4] : memref<1x64xf32, #tpu.memory_space<vmem>>, vector<1x64xf32>
    %4 = vector.broadcast %3 : vector<1x64xf32> to vector<16x64xf32>
    %5 = arith.addf %2, %4 : vector<16x64xf32>
    %cst_5 = arith.constant 0.000000e+00 : f32
    %6 = vector.broadcast %cst_5 : f32 to vector<16x64xf32>
    %7 = arith.maximumf %5, %6 : vector<16x64xf32>
    %c0_6 = arith.constant 0 : index
    %c0_7 = arith.constant 0 : index
    %8 = vector.load %arg4[%c0_6, %c0_7] : memref<64x32xf32, #tpu.memory_space<vmem>>, vector<64x32xf32>
    %cst_8 = arith.constant dense<0.000000e+00> : vector<16x32xf32>
    %9 = tpu.matmul %7, %8, %cst_8 {dimension_numbers = #tpu.dot_dimension_numbers<[1], [0], [0], [1], [0, 0, 1, 1], [], []>} : vector<16x64xf32>, vector<64x32xf32>, vector<16x32xf32> -> vector<16x32xf32>
    %c0_9 = arith.constant 0 : index
    %c0_10 = arith.constant 0 : index
    %10 = vector.load %arg5[%c0_9, %c0_10] : memref<1x32xf32, #tpu.memory_space<vmem>>, vector<1x32xf32>
    %11 = vector.broadcast %10 : vector<1x32xf32> to vector<16x32xf32>
    %12 = arith.addf %9, %11 : vector<16x32xf32>
    %c0_11 = arith.constant 0 : index
    %c0_12 = arith.constant 0 : index
    %13 = vector.load %arg6[%c0_11, %c0_12] : memref<16x32xf32, #tpu.memory_space<vmem>>, vector<16x32xf32>
    tpu.vector_store %arg6[%c0_11, %c0_12], %12 {strides = array<i32>} : memref<16x32xf32, #tpu.memory_space<vmem>>, vector<16x32xf32>,
    return
  }
  func.func @transform_0(%arg0: i32) -> (i32, i32) {
    %c0_i32 = arith.constant 0 : i32
    %c0_i32_0 = arith.constant 0 : i32
    return %arg0, %c0_i32 : i32, i32
  }
  func.func @transform_1(%arg0: i32) -> (i32, i32) {
    %c0_i32 = arith.constant 0 : i32
    %c0_i32_0 = arith.constant 0 : i32
    %c0_i32_1 = arith.constant 0 : i32
    return %c0_i32, %c0_i32_0 : i32, i32
  }
  func.func @transform_2(%arg0: i32) -> (i32, i32) {
    %c0_i32 = arith.constant 0 : i32
    %c0_i32_0 = arith.constant 0 : i32
    %c0_i32_1 = arith.constant 0 : i32
    return %c0_i32, %c0_i32_0 : i32, i32
  }
  func.func @transform_3(%arg0: i32) -> (i32, i32) {
    %c0_i32 = arith.constant 0 : i32
    %c0_i32_0 = arith.constant 0 : i32
    %c0_i32_1 = arith.constant 0 : i32
    return %c0_i32, %c0_i32_0 : i32, i32
  }
  func.func @transform_4(%arg0: i32) -> (i32, i32) {
    %c0_i32 = arith.constant 0 : i32
    %c0_i32_0 = arith.constant 0 : i32
    %c0_i32_1 = arith.constant 0 : i32
    return %c0_i32, %c0_i32_0 : i32, i32
  }
  func.func @transform_5(%arg0: i32) -> (i32, i32) {
    %c0_i32 = arith.constant 0 : i32
    %c0_i32_0 = arith.constant 0 : i32
    return %arg0, %c0_i32 : i32, i32
  }
}

</mosaic_0001>

<bundles_post_ra>
// kernel: position_wise_feed_forward.1
= control target key start
LH: loop header
LB: loop body
LE: loop exit
PB: predicated region body
PF: predicated region fallthrough
CT: control target
= control target key end

     0   :  { %vm34_vm0 = vcmask 261120   ;;  %s398_s0 = inlined_call_operand.vmem [shape: f32[16,32], index: 0, kind: input, shape index: {}]   ;;  %s399_s1 = inlined_call_operand.vmem [shape: f32[32,64], index: 1, kind: input, shape index: {}]   ;;  %s400_s2 = inlined_call_operand.vmem [shape: f32[1,64], index: 2, kind: input, shape index: {}]   ;;  %s401_s3 = inlined_call_operand.vmem [shape: f32[64,32], index: 3, kind: input, shape index: {}]   ;;  %s402_s4 = inlined_call_operand.vmem [shape: f32[1,32], index: 4, kind: input, shape index: {}]   ;;  %s403_s5 = inlined_call_operand.hbm [shape: f32[16,32], index: 5, kind: output, shape index: {}]  }
   0x1   :  { %v26_v0 = vld [vmem:[%s399_s1 + $0x18] sm:$0xff]  ;;  %v25_v1 = vld [vmem:[%s399_s1 + $0x10] sm:$0xff]  ;;  %v21_v2 = vld [vmem:[%s398_s0] sm:$0xff] }
   0x2   :  { %255 = vmatprep.subr.mxu0 %v26_v0  ;;  %v24_v3 = vld [vmem:[%s399_s1 + $0x8] sm:$0xff]  ;;  %263 = vmatprep.mubr.msk.f32.mxu0 %vm34_vm0, %v21_v2  ;;  %v125_v4 = vld [vmem:[%s401_s3 + $0x38] sm:$0xff]  ;;  %v124_v5 = vld [vmem:[%s401_s3 + $0x30] sm:$0xff] }
   0x3   :  { %256 = vmatpush3.msra.mxu0 %v26_v0  ;;  %266 = vmatprep.subr.mxu1 %v125_v4 }
   0x4   :  { %257 = vmatprep.subr.mxu0 %v25_v1 }
   0x5   :  { %10 = vsyncpa [#allocation3], 0  ;;  %258 = vmatpush3.msra.mxu0 %v25_v1  ;;  %v23_v6 = vld [vmem:[%s399_s1] sm:$0xff]  ;;  %267 = vmatpush3.msra.mxu1 %v125_v4  ;;  %v123_v7 = vld [vmem:[%s401_s3 + $0x28] sm:$0xff]  ;;  %vm133_vm1 = vcmask 523264  }
   0x6   :  { %259 = vmatprep.subr.mxu0 %v24_v3  ;;  %268 = vmatprep.subr.mxu1 %v124_v5  ;;  %v22_v8 = vld [vmem:[%s398_s0 + $0x8] sm:$0xff]  ;;  %v122_v9 = vld [vmem:[%s401_s3 + $0x20] sm:$0xff]  ;;  %v121_v10 = vld [vmem:[%s401_s3 + $0x18] sm:$0xff] }
   0x7   :  { %260 = vmatpush3.msra.mxu0 %v24_v3  ;;  %269 = vmatpush3.msra.mxu1 %v124_v5  ;;  %v120_v11 = vld [vmem:[%s401_s3 + $0x10] sm:$0xff]  ;;  %v119_v12 = vld [vmem:[%s401_s3 + $0x8] sm:$0xff]  ;;  %v118_v13 = vld [vmem:[%s401_s3] sm:$0xff]  ;;  %s310_s3 = smov [#allocation2]  }
   0x8   :  { %261 = vmatprep.subr.mxu0 %v23_v6  ;;  %270 = vmatprep.subr.mxu1 %v123_v7  ;;  %v233_v14 = vld [vmem:[%s400_s2] ss:$0 sm:$0xff]  ;;  %s222_s23 = sshll.u32 %s310_s3, 4  ;;  %s223_s23 = int_to_ptr.vmem [resolvable:$true] %s222_s23 }
   0x9   :  { %262 = vmatpush3.msra.mxu0 %v23_v6  ;;  %271 = vmatpush3.msra.mxu1 %v123_v7  ;;  %v236_v21 = vld [vmem:[%s402_s4] ss:$0 sm:$0xff]  ;;  %s288_s2 = scalar_lea.vmem %s223_s23, 256  ;;  %p293_p1 = scmp.lt.s32.totalorder %s223_s23, %s223_s23 }
   0xa   :  { %264 = vmatmul.mubr.msk.f32.vlgmr.msra.gmra.mxu0 %vm34_vm0, %v22_v8  ;;  %272 = vmatprep.subr.mxu1 %v122_v9  ;;  %p289_p0 = scmp.ne.s32.totalorder %s223_s23, %s288_s2  ;;  %p294_p2 = scmp.lt.s32.totalorder %s288_s2, %s288_s2 }
   0xb   :  { %273 = vmatpush3.msra.mxu1 %v122_v9 }
   0xc   :  { %274 = vmatprep.subr.mxu1 %v121_v10  ;;  %p295_p3 = por %p294_p2, %p293_p1 }
   0xd   :  { %275 = vmatpush3.msra.mxu1 %v121_v10 }
   0xe   :  { %276 = vmatprep.subr.mxu1 %v120_v11  ;;  %p296_p4 = pnand %p295_p3, %p289_p0 }
   0xf   :  { %277 = vmatpush3.msra.mxu1 %v120_v11 }
  0x10   :  { %278 = vmatprep.subr.mxu1 %v119_v12 }
  0x11   :  { %279 = vmatpush3.msra.mxu1 %v119_v12 }
  0x12   :  { %280 = vmatprep.subr.mxu1 %v118_v13 }
  0x13   :  { %281 = vmatpush3.msra.mxu1 %v118_v13 }
  0xca   :  { %v265_v15 = vpop.f32.mrf.mxu0 }
  0xcb   :  { %v113_v16 = vadd.f32 %v265_v15, %v233_v14 }
  0xcc   :  { %v107_v17 = vpop.f32.mrf.mxu0 }
  0xcd   :  { %v108_v18 = vadd.f32 %v233_v14, %v107_v17  ;;  %v117_v20 = vmax.f32 %v113_v16, 0.0 }
  0xcf   :  { %v116_v19 = vmax.f32 %v108_v18, 0.0 }
  0xd1   :  { %282 = vmatprep.mubr.msk.f32.mxu1 %vm133_vm1, %v116_v19 }
  0xd2   :  { %283 = vmatmul.mubr.msk.f32.vlgmr.msra.gmra.mxu1 %vm133_vm1, %v117_v20 }
 0x192   :  { %v284_v22 = vpop.f32.mrf.mxu1 }
 0x193   :  { %v212_v23 = vadd.f32 %v284_v22, %v236_v21 }
 0x194   :  { %v206_v24 = vpop.f32.mrf.mxu1 }
 0x195   :  { %216 = vst.msk [vmem:[#allocation2 + $0x8] sm:$0xff] %vm34_vm0, %v212_v23  ;;  %v207_v25 = vadd.f32 %v236_v21, %v206_v24 }
 0x197   :  { %215 = vst.msk [vmem:[#allocation2] sm:$0xff] %vm34_vm0, %v207_v25 }
 0x198   :  { %299 = shalt.err (!%p296_p4)
}
 0x199   :  { %s311_s24 = smov 128   ;;  %s312_s4 = smov 8  }
 0x19a   :  { %228 = dma.vmem_to_hbm [thread:$0]  %s223_s23, 256, %s403_s5, [#allocation3], %s311_s24, %s311_s24, %s312_s4  }
 0x19b   :  { %308 = dma.done.wait [#allocation3], 256  }
 0x19c   :  { %309 = vsyncadd [#allocation3], 4294967040 }
 0x19d   :  { %232 = vsyncpa [#allocation3], 1 }

</bundles_post_ra>
